<compile_context>
chip_gen: v6e
topology: v6e:2x2x1
jax: 0.10.0
libtpu: 0.0.40
codegen_flags: <defaults>
</compile_context>

<pallas_src>
import jax
import jax.numpy as jnp
from jax import lax
from jax.experimental import pallas as pl
from jax.experimental.pallas import tpu as pltpu


# --------------------------------------------------------------------------
# Pallas kernels
# --------------------------------------------------------------------------

def _make_conv3x3_bn_relu_kernel(n_in, H, W):
    """Fused (multi-input-concat) 3x3 conv + folded BN + ReLU, one image per step."""

    def kernel(*refs):
        x_refs = refs[:n_in]                       # (1, H, W, Ci) activation tiles
        w_refs = refs[n_in:2 * n_in]               # (9*Ci, Cout) bf16 weights
        s_ref = refs[2 * n_in]                     # (1, Cout) folded BN scale
        b_ref = refs[2 * n_in + 1]                 # (1, Cout) folded BN bias
        o_ref = refs[2 * n_in + 2]                 # (1, H, W, Cout)
        pad_refs = refs[2 * n_in + 3:3 * n_in + 3]  # (H+2, W+16, Ci) f32 VMEM scratch
        col_refs = refs[3 * n_in + 3:4 * n_in + 3]  # (H*W, 9*Ci) bf16 im2col scratch
        Cout = o_ref.shape[3]

        acc = jnp.zeros((H * W, Cout), jnp.float32)
        for x_ref, w_ref, xpad, col in zip(x_refs, w_refs, pad_refs, col_refs):
            C = x_ref.shape[3]
            # Zero-padded halo lives in VMEM; x sits at rows 1..H, cols 8..8+W
            # (sublane-aligned store offset), halo columns 7 and W+8 stay zero.
            xpad[...] = jnp.zeros_like(xpad)
            xpad[1:H + 1, 8:8 + W, :] = x_ref[0].astype(xpad.dtype)
            # im2col: 9 tap patches -> one (H*W, 9*C) bf16 slab.
            for dy in range(3):
                for dx in range(3):
                    t = dy * 3 + dx
                    col[:, t * C:(t + 1) * C] = (
                        xpad[dy:dy + H, 7 + dx:7 + dx + W, :]
                        .reshape(H * W, C).astype(col.dtype))
            # Single deep MXU matmul per input branch (concat fused by summing).
            acc = acc + jnp.dot(col[...], w_ref[...],
                                preferred_element_type=jnp.float32)

        y = jnp.maximum(acc * s_ref[0] + b_ref[0], 0.0)   # f32 epilogue (v5e-safe)
        o_ref[...] = y.astype(o_ref.dtype).reshape(1, H, W, Cout)

    return kernel


def _upconv2x2_kernel(x_ref, w_ref, b_ref, o_ref):
    # x_ref: (1, H, W, C); w_ref: (C, 4*C) bf16, columns ordered (cout, di, dj)
    # b_ref: (1, 4*C) f32;  o_ref: (1, H, W, 4*C) bf16
    H, W, C = x_ref.shape[1], x_ref.shape[2], x_ref.shape[3]
    x2 = x_ref[...].reshape(H * W, C).astype(w_ref.dtype)
    y = jnp.dot(x2, w_ref[...], preferred_element_type=jnp.float32) + b_ref[0]
    o_ref[...] = y.astype(o_ref.dtype).reshape(1, H, W, w_ref.shape[1])


# --------------------------------------------------------------------------
# Wrappers
# --------------------------------------------------------------------------

def conv3x3_bn_relu(inputs, weights, scale, bias, out_dtype=jnp.float32):
    """3x3 conv (pad=1) + folded BN + ReLU over an implicit channel-concat of
    `inputs`; `weights[i]` is the HWIO slice (3,3,Ci,Cout) matching inputs[i]."""
    N, H, W = inputs[0].shape[:3]
    Cout = weights[0].shape[-1]
    n_in = len(inputs)
    w_mats = [w.reshape(9 * w.shape[2], Cout).astype(jnp.bfloat16) for w in weights]

    in_specs = [pl.BlockSpec((1, H, W, x.shape[3]), lambda n: (n, 0, 0, 0))
                for x in inputs]
    in_specs += [pl.BlockSpec(wm.shape, lambda n: (0, 0)) for wm in w_mats]
    in_specs += [pl.BlockSpec((1, Cout), lambda n: (0, 0)),
                 pl.BlockSpec((1, Cout), lambda n: (0, 0))]
    scratch = ([pltpu.VMEM((H + 2, W + 16, x.shape[3]), jnp.float32) for x in inputs]
               + [pltpu.VMEM((H * W, 9 * x.shape[3]), jnp.bfloat16) for x in inputs])

    return pl.pallas_call(
        _make_conv3x3_bn_relu_kernel(n_in, H, W),
        out_shape=jax.ShapeDtypeStruct((N, H, W, Cout), out_dtype),
        grid=(N,),
        in_specs=in_specs,
        out_specs=pl.BlockSpec((1, H, W, Cout), lambda n: (n, 0, 0, 0)),
        scratch_shapes=scratch,
        compiler_params=pltpu.CompilerParams(dimension_semantics=("parallel",)),
    )(*inputs, *w_mats,
      scale.reshape(1, Cout).astype(jnp.float32),
      bias.reshape(1, Cout).astype(jnp.float32))


def upconv2x2_stride2(x_nhwc, w_iohw, bias):
    """ConvTranspose2d(k=2, stride=2). w_iohw: (Cin, Cout, 2, 2) (PyTorch layout)."""
    N, H, W, C = x_nhwc.shape
    Co = w_iohw.shape[1]
    w_mat = w_iohw.reshape(C, Co * 4).astype(jnp.bfloat16)   # col = cout*4 + di*2 + dj
    b_tiled = jnp.repeat(bias, 4).reshape(1, Co * 4)

    out = pl.pallas_call(
        _upconv2x2_kernel,
        out_shape=jax.ShapeDtypeStruct((N, H, W, Co * 4), jnp.bfloat16),
        grid=(N,),
        in_specs=[pl.BlockSpec((1, H, W, C), lambda n: (n, 0, 0, 0)),
                  pl.BlockSpec((C, Co * 4), lambda n: (0, 0)),
                  pl.BlockSpec((1, Co * 4), lambda n: (0, 0))],
        out_specs=pl.BlockSpec((1, H, W, Co * 4), lambda n: (n, 0, 0, 0)),
        compiler_params=pltpu.CompilerParams(dimension_semantics=("parallel",)),
    )(x_nhwc, w_mat, b_tiled)

    # TODO(synk): sub-pixel un-shuffle remains an XLA reshape/transpose (bf16 data).
    y = out.reshape(N, H, W, Co, 2, 2).transpose(0, 1, 4, 2, 5, 3)
    return y.reshape(N, 2 * H, 2 * W, Co)


# --------------------------------------------------------------------------
# Up module (forward)
# --------------------------------------------------------------------------

def init_params(key, in_channels, out_channels):
    c_up = in_channels - out_channels
    eps = 1e-5
    ks = jax.random.split(key, 6)

    up_w = 0.1 * jax.random.normal(ks[0], (c_up, c_up, 2, 2), jnp.float32)
    up_b = 0.05 * jax.random.normal(ks[1], (c_up,), jnp.float32)

    w1_oihw = 0.1 * jax.random.normal(ks[2], (out_channels, in_channels, 3, 3), jnp.float32)
    b1 = 0.05 * jax.random.normal(ks[3], (out_channels,), jnp.float32)
    w2_oihw = 0.1 * jax.random.normal(ks[4], (out_channels, out_channels, 3, 3), jnp.float32)
    b2 = 0.05 * jax.random.normal(ks[5], (out_channels,), jnp.float32)

    # BatchNorm2d fresh-init (gamma=1, beta=0, rm=0, rv=1), eval-mode fold.
    gamma = jnp.ones((out_channels,), jnp.float32)
    beta = jnp.zeros((out_channels,), jnp.float32)
    rmean = jnp.zeros((out_channels,), jnp.float32)
    rvar = jnp.ones((out_channels,), jnp.float32)
    bn_scale = gamma / jnp.sqrt(rvar + eps)

    return dict(
        up_w=up_w, up_b=up_b,
        w1=jnp.transpose(w1_oihw, (2, 3, 1, 0)),          # OIHW -> HWIO
        s1=bn_scale, bb1=(b1 - rmean) * bn_scale + beta,
        w2=jnp.transpose(w2_oihw, (2, 3, 1, 0)),
        s2=bn_scale, bb2=(b2 - rmean) * bn_scale + beta,
    )


def up_forward(params, x_nchw, skip_nchw):
    x = jnp.transpose(x_nchw, (0, 2, 3, 1)).astype(jnp.float32)
    skip = jnp.transpose(skip_nchw, (0, 2, 3, 1)).astype(jnp.float32)

    xu = upconv2x2_stride2(x, params["up_w"], params["up_b"])   # bf16, NHWC
    c_up = xu.shape[-1]
    # concat fused: w1 split along Cin (x channels first, matching torch.cat order)
    h = conv3x3_bn_relu(
        [xu, skip],
        [params["w1"][:, :, :c_up, :], params["w1"][:, :, c_up:, :]],
        params["s1"], params["bb1"], out_dtype=jnp.bfloat16)
    h = conv3x3_bn_relu([h], [params["w2"]], params["s2"], params["bb2"],
                        out_dtype=jnp.float32)
    return jnp.transpose(h, (0, 3, 1, 2))


# --------------------------------------------------------------------------
# Pure-JAX reference (matching bf16 operand precision)
# --------------------------------------------------------------------------

def _ref_upconv(x_nhwc, w, b):
    N, H, W, _ = x_nhwc.shape
    y = jnp.einsum("nijc,code->nidjeo",
                   x_nhwc.astype(jnp.bfloat16), w.astype(jnp.bfloat16),
                   preferred_element_type=jnp.float32)
    y = y.reshape(N, 2 * H, 2 * W, -1) + b
    return y.astype(jnp.bfloat16)


def _ref_conv_bn_relu(x_nhwc, w_hwio, scale, bias):
    y = lax.conv_general_dilated(
        x_nhwc.astype(jnp.bfloat16), w_hwio.astype(jnp.bfloat16),
        window_strides=(1, 1), padding="SAME",
        dimension_numbers=("NHWC", "HWIO", "NHWC"),
        preferred_element_type=jnp.float32)
    return jnp.maximum(y * scale + bias, 0.0)


def up_forward_ref(params, x_nchw, skip_nchw):
    x = jnp.transpose(x_nchw, (0, 2, 3, 1))
    skip = jnp.transpose(skip_nchw, (0, 2, 3, 1))
    xu = _ref_upconv(x, params["up_w"], params["up_b"])
    cat = jnp.concatenate([xu.astype(jnp.float32), skip], axis=-1)
    h = _ref_conv_bn_relu(cat, params["w1"], params["s1"], params["bb1"]).astype(jnp.bfloat16)
    h = _ref_conv_bn_relu(h, params["w2"], params["s2"], params["bb2"])
    return jnp.transpose(h, (0, 3, 1, 2))


# --------------------------------------------------------------------------

if __name__ == "__main__":
    # UNet.up_conv3-like block: Up(in_channels=128+256=384, out_channels=128)
    in_channels, out_channels = 384, 128
    c_up = in_channels - out_channels          # 256 (x channels)
    c_skip = out_channels                      # 128 (skip channels)
    N, H, W = 2, 8, 8                          # x spatial; skip/out spatial = 16x16

    key = jax.random.PRNGKey(0)
    kx, ksk, kp = jax.random.split(key, 3)
    x = jax.random.normal(kx, (N, c_up, H, W), jnp.float32)
    skip = jax.random.normal(ksk, (N, c_skip, 2 * H, 2 * W), jnp.float32)
    params = init_params(kp, in_channels, out_channels)

    out = jax.block_until_ready(up_forward(params, x, skip))
    assert out.shape == (N, out_channels, 2 * H, 2 * W), out.shape

    ref = jax.block_until_ready(up_forward_ref(params, x, skip))
    max_err = float(jnp.max(jnp.abs(out - ref)))
    assert jnp.allclose(out, ref, atol=2e-2, rtol=2e-2), max_err

    print("KERNEL_OK")
</pallas_src>

<mosaic_0001>
module attributes {stable_mosaic.version = 11 : i64} {
  func.func @_upconv2x2_kernel(%arg0: i32, %arg1: memref<1x8x8x256xf32, #tpu.memory_space<vmem>>, %arg2: memref<256x1024xbf16, #tpu.memory_space<vmem>>, %arg3: memref<1x1024xf32, #tpu.memory_space<vmem>>, %arg4: memref<1x8x8x1024xbf16, #tpu.memory_space<vmem>>) attributes {dimension_semantics = [#tpu.dimension_semantics<parallel>], iteration_bounds = array<i64: 2>, scalar_prefetch = 0 : i64, scratch_operands = 0 : i64, tpu.core_type = #tpu.core_type<tc>, window_params = [{transform_indices = @transform_0, window_bounds = array<i64: 1, 8, 8, 256>}, {pipeline_mode = #tpu.pipeline_mode<synchronous>, transform_indices = @transform_1, window_bounds = array<i64: 256, 1024>}, {pipeline_mode = #tpu.pipeline_mode<synchronous>, transform_indices = @transform_2, window_bounds = array<i64: 1, 1024>}, {transform_indices = @transform_3, window_bounds = array<i64: 1, 8, 8, 1024>}]} {
    %c0 = arith.constant 0 : index
    %c0_0 = arith.constant 0 : index
    %c0_1 = arith.constant 0 : index
    %c0_2 = arith.constant 0 : index
    %0 = vector.load %arg1[%c0, %c0_0, %c0_1, %c0_2] : memref<1x8x8x256xf32, #tpu.memory_space<vmem>>, vector<1x8x8x256xf32>
    %1 = vector.shape_cast %0 : vector<1x8x8x256xf32> to vector<64x256xf32>
    %2 = arith.truncf %1 : vector<64x256xf32> to vector<64x256xbf16>
    %c0_3 = arith.constant 0 : index
    %c0_4 = arith.constant 0 : index
    %3 = vector.load %arg2[%c0_3, %c0_4] : memref<256x1024xbf16, #tpu.memory_space<vmem>>, vector<256x1024xbf16>
    %cst = arith.constant dense<0.000000e+00> : vector<64x1024xf32>
    %4 = tpu.matmul %2, %3, %cst {dimension_numbers = #tpu.dot_dimension_numbers<[1], [0], [0], [1], [0, 0, 1, 1], [], []>} : vector<64x256xbf16>, vector<256x1024xbf16>, vector<64x1024xf32> -> vector<64x1024xf32>
    %c0_5 = arith.constant 0 : index
    %c0_6 = arith.constant 0 : index
    %5 = vector.load %arg3[%c0_5, %c0_6] : memref<1x1024xf32, #tpu.memory_space<vmem>>, vector<1x1024xf32>
    %6 = vector.shape_cast %5 : vector<1x1024xf32> to vector<1024xf32>
    %7 = vector.shape_cast %6 : vector<1024xf32> to vector<1x1024xf32>
    %8 = vector.broadcast %7 : vector<1x1024xf32> to vector<64x1024xf32>
    %9 = arith.addf %4, %8 : vector<64x1024xf32>
    %10 = arith.truncf %9 : vector<64x1024xf32> to vector<64x1024xbf16>
    %11 = vector.shape_cast %10 : vector<64x1024xbf16> to vector<1x8x8x1024xbf16>
    %c0_7 = arith.constant 0 : index
    %c0_8 = arith.constant 0 : index
    %c0_9 = arith.constant 0 : index
    %c0_10 = arith.constant 0 : index
    %12 = vector.load %arg4[%c0_7, %c0_8, %c0_9, %c0_10] : memref<1x8x8x1024xbf16, #tpu.memory_space<vmem>>, vector<1x8x8x1024xbf16>
    tpu.vector_store %arg4[%c0_7, %c0_8, %c0_9, %c0_10], %11 {strides = array<i32>} : memref<1x8x8x1024xbf16, #tpu.memory_space<vmem>>, vector<1x8x8x1024xbf16>,
    return
  }
  func.func @transform_0(%arg0: i32) -> (i32, i32, i32, i32) {
    %c0_i32 = arith.constant 0 : i32
    %c0_i32_0 = arith.constant 0 : i32
    %c0_i32_1 = arith.constant 0 : i32
    %c0_i32_2 = arith.constant 0 : i32
    return %arg0, %c0_i32, %c0_i32_0, %c0_i32_1 : i32, i32, i32, i32
  }
  func.func @transform_1(%arg0: i32) -> (i32, i32) {
    %c0_i32 = arith.constant 0 : i32
    %c0_i32_0 = arith.constant 0 : i32
    %c0_i32_1 = arith.constant 0 : i32
    return %c0_i32, %c0_i32_0 : i32, i32
  }
  func.func @transform_2(%arg0: i32) -> (i32, i32) {
    %c0_i32 = arith.constant 0 : i32
    %c0_i32_0 = arith.constant 0 : i32
    %c0_i32_1 = arith.constant 0 : i32
    return %c0_i32, %c0_i32_0 : i32, i32
  }
  func.func @transform_3(%arg0: i32) -> (i32, i32, i32, i32) {
    %c0_i32 = arith.constant 0 : i32
    %c0_i32_0 = arith.constant 0 : i32
    %c0_i32_1 = arith.constant 0 : i32
    %c0_i32_2 = arith.constant 0 : i32
    return %arg0, %c0_i32, %c0_i32_0, %c0_i32_1 : i32, i32, i32, i32
  }
}

</mosaic_0001>

<bundles_post_ra>
// kernel: tpu_custom_call.1
= control target key start
LH: loop header
LB: loop body
LE: loop exit
PB: predicated region body
PF: predicated region fallthrough
CT: control target
= control target key end

     0   :  { %8 = vsyncpa [#allocation3], 0  ;;  %s2527_s0 = inlined_call_operand.hbm [shape: f32[2,8,8,256], index: 0, kind: input, shape index: {}]   ;;  %s2528_s1 = inlined_call_operand.hbm [shape: bf16[256,1024], index: 1, kind: input, shape index: {}]   ;;  %s2529_s2 = inlined_call_operand.hbm [shape: f32[1,1024], index: 2, kind: input, shape index: {}]   ;;  %s2530_s3 = inlined_call_operand.hbm [shape: bf16[2,8,8,1024], index: 3, kind: output, shape index: {}]  }
   0x1   :  { %10 = vsyncpa [#allocation3 + $0x1], 0 }
   0x2   :  { %11 = vsyncpa [#allocation6], 0 }
   0x3   :  { %12 = vsyncpa [#allocation4], 0 }
   0x4   :  { %14 = vsyncpa [#allocation4 + $0x1], 0  ;;  %s2137_s12 = smov 0   ;;  %s2139_s13 = smov 0  }
   0x5   :  { %s2141_s14 = smov 0   ;;  %s2143_s15 = smov 0  }
   0x6 LB: > { %s2158_s16 = sadd.s32 4294967295, %s2105_s15   ;;  %s1672_s17 = sadd.s32 4294967294, %s2105_s15   ;;  %s2105_s15 = sphi %s2143_s15, %s2552_s15   ;;  %s2101_s14 = sphi %s2141_s14, %s2551_s14   ;;  %s2097_s13 = sphi %s2139_s13, %s2550_s13   ;;  %s2093_s12 = sphi %s2137_s12, %s2549_s12  }
   0x7   : > { %p40_p0 = scmp.ne.s32.totalorder %s2097_s13, %s2093_s12  ;;  %p2531_p1 = scmp.eq.s32.totalorder %s2158_s16, 0 }
   0x8   : > { %p112_p3 = scmp.eq.s32.totalorder %s1672_s17, 1  ;;  %p1673_p5 = scmp.ge.s32.totalorder %s2105_s15, 1 }
   0x9   : > { %p2167_p4 = por %p2531_p1, %p40_p0  ;;  %p119_p7 = scmp.lt.s32.totalorder %s2105_s15, 3 }
   0xa   : > { %p2172_p6 = por %p112_p3, %p40_p0  ;;  %s2107_s21 = smov [#allocation5]  }
   0xb   : > { %s2535_s18 = scalar_select %p2167_p4, 1, 0 }
   0xc   : > { %s2536_s19 = scalar_select %p2172_p6, 1, 0 }
   0xd   : > { %p2177_p8 = pnand %p1673_p5, %p119_p7  ;;  %s131_s22 = sshll.u32 %s2107_s21, 4  ;;  %s132_s22 = int_to_ptr.vmem [resolvable:$true] %s131_s22 }
   0xe   : > { %s2108_s24 = smov [#allocation7]   ;;  %s1968_s26 = scalar_lea.vmem %s132_s22, 16384 }
   0xf   : > { %s2537_s20 = scalar_select %p2177_p8, 1, 0 }
  0x10   : > { %p1896_p9 = pneg %p2177_p8  ;;  %s145_s25 = sshll.u32 %s2108_s24, 4  ;;  %s146_s25 = int_to_ptr.vmem [resolvable:$true] %s145_s25 }
  0x11   : > { %p1969_p13 = scmp.ne.s32.totalorder %s132_s22, %s1968_s26  ;;  %p1976_p5 = scmp.lt.s32.totalorder %s132_s22, %s132_s22 }
  0x12   : > { %p2186_p11 = pnand %p1896_p9, %p2531_p1  ;;  %p1977_p7 = scmp.lt.s32.totalorder %s1968_s26, %s1968_s26 }
  0x14   : > { %p1959_p12 = pneg %p2186_p11  ;;  %p1978_p10 = por %p1977_p7, %p1976_p5 }
  0x16   : > { %p1971_p0 = pnand %p1969_p13, %p1959_p12 }
  0x18   : > { %p1972_p3 = pneg %p1971_p0 }
  0x1a   : > { %p1979_p9 = pnand %p1978_p10, %p1972_p3 }
  0x1c   : > { %1982 = shalt.err (!%p1979_p9)
}
  0x1d   : > { %s2109_s27 = smov 512   ;;  %s2110_s28 = smov 32  }
  0x1e   : > { %1899 = dma.hbm_to_vmem [thread:$0]  (!%p2186_p11), %s2528_s1, 16384, %s132_s22, [#allocation6], %s2109_s27, %s2109_s27, %s2110_s28  }
  0x1f   : > { %s1994_s4 = scalar_lea.vmem %s146_s25, 128  ;;  %p2002_p2 = scmp.lt.s32.totalorder %s146_s25, %s146_s25 }
  0x20   : > { %p1995_p1 = scmp.ne.s32.totalorder %s146_s25, %s1994_s4  ;;  %p2003_p6 = scmp.lt.s32.totalorder %s1994_s4, %s1994_s4 }
  0x22   : > { %p1997_p13 = pnand %p1995_p1, %p1959_p12  ;;  %p2004_p5 = por %p2003_p6, %p2002_p2 }
  0x24   : > { %p1998_p0 = pneg %p1997_p13 }
  0x26   : > { %p2005_p10 = pnand %p2004_p5, %p1998_p0 }
  0x28   : > { %2008 = shalt.err (!%p2005_p10)
}
  0x29   : > { %1902 = dma.hbm_to_vmem [thread:$0]  (!%p2186_p11), %s2529_s2, 128, %s146_s25, [#allocation6]  }
  0x2a   : > { %s2209_s7 = sadd.s32 1, %s2105_s15   ;;  %s27_s8 = sadd.s32 1, %s2101_s14 }
  0x2b   : > { %s24_s9 = ssub.s32 %s2105_s15, %s2209_s7  ;;  %p34_p1 = scmp.ne.s32.totalorder %s2101_s14, %s2097_s13 }
  0x2c   : > { %p25_p2 = scmp.eq.s32.totalorder %s24_s9, 0  ;;  %p35_p6 = scmp.eq.s32.totalorder %s2105_s15, 0 }
  0x2d   : > { %p2539_p12 = scmp.eq.s32.totalorder %s2158_s16, 1  ;;  %p1913_p7 = scmp.lt.s32.totalorder %s2105_s15, 2 }
  0x2e   : > { %s2225_s11 = scalar_select %p25_p2, %s2101_s14, %s27_s8  }
  0x2f   : > { %p2219_p3 = por %p2539_p12, %p34_p1  ;;  %p36_p9 = por %p35_p6, %p34_p1 }
  0x30   : > { %s156_s17 = sand.u32 1, %s2101_s14   ;;  %s1850_s22 = sshll.u32 %s2105_s15, 11 }
  0x31   : > { %s2540_s10 = scalar_select %p2219_p3, 1, 0 }
  0x32   : > { %s1677_s21 = sshll.u32 %s156_s17, 7  ;;  %s2232_s25 = scalar_lea.hbm %s2527_s0, %s1850_s22 }
  0x33   : > { %s160_s26 = scalar_lea.vmem [#allocation2], %s1677_s21  ;;  %p2236_p11 = pnand %p1913_p7, %p36_p9 }
  0x34   : > { %s167_s27 = sshll.u32 %s160_s26, 4  ;;  %s2240_s29 = scalar_lea.sflag [#allocation3], %s156_s17  ;;  %s2234_s27 = int_to_ptr.vmem [resolvable:$true] %s167_s27 }
  0x35   : > { %s2009_s30 = scalar_lea.hbm %s2232_s25, 2048  ;;  %p2011_p0 = pneg %p2236_p11 }
  0x36   : > { %p2010_p13 = scmp.ne.s32.totalorder %s2232_s25, %s2009_s30  ;;  %s2014_s6 = scalar_lea.hbm %s2527_s0, 4096 }
  0x37   : > { %p2015_p1 = scmp.lt.s32.totalorder %s2232_s25, %s2527_s0  ;;  %p2016_p2 = scmp.lt.s32.totalorder %s2014_s6, %s2009_s30 }
  0x38   : > { %p2012_p5 = pnand %p2011_p0, %p2010_p13 }
  0x39   : > { %p2017_p6 = por %p2016_p2, %p2015_p1 }
  0x3a   : > { %p2013_p10 = pneg %p2012_p5 }
  0x3c   : > { %p2018_p12 = pnand %p2017_p6, %p2013_p10 }
  0x3e   : > { %2021 = shalt.err (!%p2018_p12)
}
  0x3f   : > { %s2022_s17 = scalar_lea.vmem %s2234_s27, 2048  ;;  %s2111_s21 = smov [#allocation2]  }
  0x40   : > { %p2023_p7 = scmp.ne.s32.totalorder %s2234_s27, %s2022_s17  ;;  %s2027_s22 = sshll.u32 %s2111_s21, 4  ;;  %s2028_s22 = int_to_ptr.vmem [resolvable:$false] %s2027_s22 }
  0x41   : > { %s2029_s23 = scalar_lea.vmem %s2028_s22, 4096  ;;  %p2030_p5 = scmp.lt.s32.totalorder %s2234_s27, %s2028_s22 }
  0x42   : > { %p2025_p9 = pnand %p2023_p7, %p2011_p0  ;;  %p2031_p3 = scmp.lt.s32.totalorder %s2029_s23, %s2022_s17 }
  0x44   : > { %p2026_p13 = pneg %p2025_p9  ;;  %p2032_p4 = por %p2031_p3, %p2030_p5 }
  0x46   : > { %p2033_p8 = pnand %p2032_p4, %p2026_p13 }
  0x48   : > { %2036 = shalt.err (!%p2033_p8)
}
  0x49   : > { %s2112_s24 = smov 256   ;;  %s2113_s26 = smov 16  }
  0x4a   : > { %1906 = dma.hbm_to_vmem [thread:$0]  (!%p2236_p11), %s2232_s25, 2048, %s2234_s27, %s2240_s29, %s2112_s24, %s2112_s24, %s2113_s26  }
  0x4b   : > { %p2542_p0 = scmp.ne.s32.totalorder %s2537_s20, 0 }
  0x4c   : > { %s2264_s30 = sand.u32 (!%p2542_p0), 1, %s2097_s13   ;;  %p2543_p4 = scmp.ne.s32.totalorder (!%p2542_p0), %s2535_s18, 0 }
  0x4d   : > { %179 = sbr.rel (%p2542_p0) target bundleno = 459 (0x1cb), region = 32  ;;  %s1681_s4 = sshll.u32 (!%p2542_p0), %s2264_s30, 7 }
  0x4e   : > { %s182_s5 = scalar_lea.sflag (!%p2542_p0), [#allocation3], %s2264_s30  ;;  %s2268_s6 = scalar_lea.vmem (!%p2542_p0), [#allocation2], %s1681_s4 }
  0x52   : > { %2080 = dma.done.wait (%p2543_p4), %s182_s5, 2048  }
  0x53   : > { %2082 = vsyncadd (%p2543_p4), %s182_s5, 4294965248  ;;  %p2544_p8 = scmp.eq.s32.totalorder %s2158_s16, 0 }
  0x55   : > { %2084 = dma.done.wait (%p2544_p8), [#allocation6], 16512   ;;  %p2545_p3 = pmov %p2544_p8 }
  0x56   : > { %v296_v0 = vld [vmem:[#allocation5 + $0x1c0] sm:$0xff]  ;;  %v297_v2 = vld [vmem:[#allocation5 + $0x1c8] sm:$0xff]  ;;  %v219_v54 = vld [vmem:[%s2268_s6 + $0x18] sm:$0xff]  ;;  %s1684_s18 = sshll.u32 %s2264_s30, 8  ;;  %s1883_s25 = sshll.u32 %s2158_s16, 12 }
  0x57   : > { %2086 = vsyncadd (%p2545_p3), [#allocation6], 4294950784  ;;  %v300_v1 = vld [vmem:[#allocation5 + $0x1e0] sm:$0xff]  ;;  %v301_v4 = vld [vmem:[#allocation5 + $0x1e8] sm:$0xff]  ;;  %s2367_s20 = scalar_lea.vmem [#allocation8], %s1684_s18  ;;  %s2480_s8 = scalar_lea.hbm %s2530_s3, %s1883_s25 }
  0x58   : > { %v1742_v3 = vcombine.high %v296_v0, %v300_v1  ;;  %v1741_v5 = vcombine.low %v296_v0, %v300_v1  ;;  %v288_v6 = vld [vmem:[#allocation5 + $0x180] sm:$0xff]  ;;  %v1744_v8 = vcombine.high %v297_v2, %v301_v4  ;;  %v1743_v9 = vcombine.low %v297_v2, %v301_v4  ;;  %v289_v11 = vld [vmem:[#allocation5 + $0x188] sm:$0xff]  ;;  %s1580_s27 = sshll.u32 %s2367_s20, 4  ;;  %s1567_s16 = scalar_lea.sflag [#allocation4], %s2264_s30  ;;  %s2482_s27 = int_to_ptr.vmem [resolvable:$true] %s1580_s27 }
  0x59   : > { %v292_v7 = vld [vmem:[#allocation5 + $0x1a0] sm:$0xff]  ;;  %v293_v12 = vld [vmem:[#allocation5 + $0x1a8] sm:$0xff]  ;;  %s2037_s9 = scalar_lea.vmem %s2482_s27, 4096  ;;  %p2546_p10 = scmp.ne.s32.totalorder %s2540_s10, 0 }
  0x5a   : > { %v1734_v10 = vcombine.high %v288_v6, %v292_v7  ;;  %v280_v13 = vld [vmem:[#allocation5 + $0x140] sm:$0xff]  ;;  %1050 = vmatprep.subr.bf16.mxu0 %v1742_v3  ;;  %v1736_v14 = vcombine.high %v289_v11, %v293_v12  ;;  %v281_v16 = vld [vmem:[#allocation5 + $0x148] sm:$0xff]  ;;  %1123 = vmatprep.subr.bf16.mxu1 %v1744_v8  ;;  %v1733_v18 = vcombine.low %v288_v6, %v292_v7  ;;  %p2038_p11 = scmp.ne.s32.totalorder %s2482_s27, %s2037_s9  ;;  %s2114_s17 = smov [#allocation8]  }
  0x5b   : > { %v284_v15 = vld [vmem:[#allocation5 + $0x160] sm:$0xff]  ;;  %v285_v17 = vld [vmem:[#allocation5 + $0x168] sm:$0xff]  ;;  %1051 = vmatpush1.bf16.msra.mxu0 %v1741_v5  ;;  %1124 = vmatpush1.bf16.msra.mxu1 %v1743_v9  ;;  %v1735_v19 = vcombine.low %v289_v11, %v293_v12  ;;  %s2041_s21 = sshll.u32 %s2114_s17, 4  ;;  %s2042_s21 = int_to_ptr.vmem [resolvable:$false] %s2041_s21 }
  0x5c   : > { %1052 = vmatprep.subr.bf16.mxu0 %v1734_v10  ;;  %v1726_v20 = vcombine.high %v280_v13, %v284_v15  ;;  %1125 = vmatprep.subr.bf16.mxu1 %v1736_v14  ;;  %v1728_v21 = vcombine.high %v281_v16, %v285_v17  ;;  %v272_v22 = vld [vmem:[#allocation5 + $0x100] sm:$0xff]  ;;  %v273_v24 = vld [vmem:[#allocation5 + $0x108] sm:$0xff]  ;;  %v1725_v26 = vcombine.low %v280_v13, %v284_v15  ;;  %p2039_p1 = pnand %p2038_p11, %p2546_p10  ;;  %s2043_s22 = scalar_lea.vmem %s2042_s21, 8192 }
  0x5d   : > { %v276_v23 = vld [vmem:[#allocation5 + $0x120] sm:$0xff]  ;;  %v277_v25 = vld [vmem:[#allocation5 + $0x128] sm:$0xff]  ;;  %v1727_v27 = vcombine.low %v281_v16, %v285_v17  ;;  %p2044_p6 = scmp.lt.s32.totalorder %s2482_s27, %s2042_s21  ;;  %p2045_p12 = scmp.lt.s32.totalorder %s2043_s22, %s2037_s9 }
  0x5e   : > { %v1718_v28 = vcombine.high %v272_v22, %v276_v23  ;;  %v1720_v29 = vcombine.high %v273_v24, %v277_v25  ;;  %v264_v30 = vld [vmem:[#allocation5 + $0xc0] sm:$0xff]  ;;  %v265_v32 = vld [vmem:[#allocation5 + $0xc8] sm:$0xff]  ;;  %v1717_v34 = vcombine.low %v272_v22, %v276_v23  ;;  %v1719_v35 = vcombine.low %v273_v24, %v277_v25  ;;  %p2040_p2 = pneg %p2039_p1 }
  0x5f   : > { %1053 = vmatpush1.bf16.msra.mxu0 %v1733_v18  ;;  %1126 = vmatpush1.bf16.msra.mxu1 %v1735_v19  ;;  %v268_v31 = vld [vmem:[#allocation5 + $0xe0] sm:$0xff]  ;;  %v269_v33 = vld [vmem:[#allocation5 + $0xe8] sm:$0xff]  ;;  %p2046_p7 = por %p2045_p12, %p2044_p6 }
  0x60   : > { %1054 = vmatprep.subr.bf16.mxu0 %v1726_v20  ;;  %1127 = vmatprep.subr.bf16.mxu1 %v1728_v21  ;;  %v1710_v36 = vcombine.high %v264_v30, %v268_v31  ;;  %v1712_v37 = vcombine.high %v265_v32, %v269_v33  ;;  %v256_v38 = vld [vmem:[#allocation5 + $0x80] sm:$0xff]  ;;  %v257_v40 = vld [vmem:[#allocation5 + $0x88] sm:$0xff]  ;;  %v1709_v42 = vcombine.low %v264_v30, %v268_v31 }
  0x61   : > { %v260_v39 = vld [vmem:[#allocation5 + $0xa0] sm:$0xff]  ;;  %v261_v41 = vld [vmem:[#allocation5 + $0xa8] sm:$0xff]  ;;  %v1711_v43 = vcombine.low %v265_v32, %v269_v33  ;;  %p2047_p9 = pnand %p2046_p7, %p2040_p2 }
  0x62   : > { %v1702_v44 = vcombine.high %v256_v38, %v260_v39  ;;  %v1704_v45 = vcombine.high %v257_v40, %v261_v41  ;;  %v248_v46 = vld [vmem:[#allocation5 + $0x40] sm:$0xff]  ;;  %v249_v48 = vld [vmem:[#allocation5 + $0x48] sm:$0xff]  ;;  %v1701_v50 = vcombine.low %v256_v38, %v260_v39  ;;  %v1703_v51 = vcombine.low %v257_v40, %v261_v41 }
  0x63   : > { %1055 = vmatpush1.bf16.msra.mxu0 %v1725_v26  ;;  %1128 = vmatpush1.bf16.msra.mxu1 %v1727_v27  ;;  %v252_v47 = vld [vmem:[#allocation5 + $0x60] sm:$0xff]  ;;  %v253_v49 = vld [vmem:[#allocation5 + $0x68] sm:$0xff] }
  0x64   : > { %1056 = vmatprep.subr.bf16.mxu0 %v1718_v28  ;;  %1129 = vmatprep.subr.bf16.mxu1 %v1720_v29  ;;  %v1694_v52 = vcombine.high %v248_v46, %v252_v47  ;;  %v217_v53 = vld [vmem:[%s2268_s6 + $0x8] sm:$0xff]  ;;  %v1696_v55 = vcombine.high %v249_v48, %v253_v49  ;;  %v240_v56 = vld [vmem:[#allocation5] sm:$0xff]  ;;  %v1693_v61 = vcombine.low %v248_v46, %v252_v47 }
  0x65   : > { %v244_v57 = vld [vmem:[#allocation5 + $0x20] sm:$0xff]  ;;  %v2280_v58 = vpack.c.bf16 %v219_v54, %v217_v53  ;;  %v241_v59 = vld [vmem:[#allocation5 + $0x8] sm:$0xff]  ;;  %v1695_v62 = vcombine.low %v249_v48, %v253_v49 }
  0x66   : > { %v245_v60 = vld [vmem:[#allocation5 + $0x28] sm:$0xff]  ;;  %v1686_v63 = vcombine.high %v240_v56, %v244_v57  ;;  %v360_v1 = vld [vmem:[#allocation5 + $0x3c0] sm:$0xff]  ;;  %v1685_v5 = vcombine.low %v240_v56, %v244_v57 }
  0x67   : > { %1057 = vmatpush1.bf16.msra.mxu0 %v1717_v34  ;;  %1130 = vmatpush1.bf16.msra.mxu1 %v1719_v35  ;;  %v1688_v0 = vcombine.high %v241_v59, %v245_v60  ;;  %v364_v2 = vld [vmem:[#allocation5 + $0x3e0] sm:$0xff]  ;;  %v361_v3 = vld [vmem:[#allocation5 + $0x3c8] sm:$0xff]  ;;  %v1687_v6 = vcombine.low %v241_v59, %v245_v60 }
  0x68   : > { %1058 = vmatprep.subr.bf16.mxu0 %v1710_v36  ;;  %1131 = vmatprep.subr.bf16.mxu1 %v1712_v37  ;;  %v365_v4 = vld [vmem:[#allocation5 + $0x3e8] sm:$0xff]  ;;  %v1806_v7 = vcombine.high %v360_v1, %v364_v2  ;;  %v352_v9 = vld [vmem:[#allocation5 + $0x380] sm:$0xff]  ;;  %v1805_v13 = vcombine.low %v360_v1, %v364_v2  ;;  %v298_v2 = vld [vmem:[#allocation5 + $0x1d0] sm:$0xff] }
  0x69   : > { %1082 = vmatprep.mubr.bf16.mxu0 %v2280_v58  ;;  %1155 = vmatprep.mubr.bf16.mxu1 %v2280_v58  ;;  %v1808_v8 = vcombine.high %v361_v3, %v365_v4  ;;  %v356_v10 = vld [vmem:[#allocation5 + $0x3a0] sm:$0xff]  ;;  %v353_v11 = vld [vmem:[#allocation5 + $0x388] sm:$0xff]  ;;  %v1807_v14 = vcombine.low %v361_v3, %v365_v4  ;;  %v302_v3 = vld [vmem:[#allocation5 + $0x1f0] sm:$0xff] }
  0x6a   : > { %v357_v12 = vld [vmem:[#allocation5 + $0x3a8] sm:$0xff]  ;;  %v1798_v15 = vcombine.high %v352_v9, %v356_v10  ;;  %v344_v17 = vld [vmem:[#allocation5 + $0x340] sm:$0xff]  ;;  %v1797_v21 = vcombine.low %v352_v9, %v356_v10  ;;  %v299_v4 = vld [vmem:[#allocation5 + $0x1d8] sm:$0xff]  ;;  %v1746_v10 = vcombine.high %v298_v2, %v302_v3 }
  0x6b   : > { %1059 = vmatpush1.bf16.msra.mxu0 %v1709_v42  ;;  %1132 = vmatpush1.bf16.msra.mxu1 %v1711_v43  ;;  %v1800_v16 = vcombine.high %v353_v11, %v357_v12  ;;  %v348_v18 = vld [vmem:[#allocation5 + $0x360] sm:$0xff]  ;;  %v345_v19 = vld [vmem:[#allocation5 + $0x348] sm:$0xff]  ;;  %v1799_v22 = vcombine.low %v353_v11, %v357_v12  ;;  %v290_v12 = vld [vmem:[#allocation5 + $0x190] sm:$0xff] }
  0x6c   : > { %1060 = vmatprep.subr.bf16.mxu0 %v1702_v44  ;;  %1133 = vmatprep.subr.bf16.mxu1 %v1704_v45  ;;  %v349_v20 = vld [vmem:[#allocation5 + $0x368] sm:$0xff]  ;;  %v1790_v23 = vcombine.high %v344_v17, %v348_v18  ;;  %v336_v25 = vld [vmem:[#allocation5 + $0x300] sm:$0xff]  ;;  %v1789_v29 = vcombine.low %v344_v17, %v348_v18  ;;  %v223_v18 = vld [vmem:[%s2268_s6 + $0x38] sm:$0xff] }
  0x6d   : > { %v1792_v24 = vcombine.high %v345_v19, %v349_v20  ;;  %v340_v26 = vld [vmem:[#allocation5 + $0x320] sm:$0xff]  ;;  %v337_v27 = vld [vmem:[#allocation5 + $0x308] sm:$0xff]  ;;  %v1791_v30 = vcombine.low %v345_v19, %v349_v20  ;;  %v1745_v19 = vcombine.low %v298_v2, %v302_v3 }
  0x6e   : > { %v341_v28 = vld [vmem:[#allocation5 + $0x328] sm:$0xff]  ;;  %v1782_v31 = vcombine.high %v336_v25, %v340_v26  ;;  %v328_v33 = vld [vmem:[#allocation5 + $0x2c0] sm:$0xff]  ;;  %v1781_v37 = vcombine.low %v336_v25, %v340_v26  ;;  %v283_v26 = vld [vmem:[#allocation5 + $0x158] sm:$0xff] }
  0x6f   : > { %1061 = vmatpush1.bf16.msra.mxu0 %v1701_v50  ;;  %1134 = vmatpush1.bf16.msra.mxu1 %v1703_v51  ;;  %v1784_v32 = vcombine.high %v337_v27, %v341_v28  ;;  %v332_v34 = vld [vmem:[#allocation5 + $0x2e0] sm:$0xff]  ;;  %v329_v35 = vld [vmem:[#allocation5 + $0x2c8] sm:$0xff]  ;;  %v1783_v38 = vcombine.low %v337_v27, %v341_v28  ;;  %v287_v27 = vld [vmem:[#allocation5 + $0x178] sm:$0xff] }
  0x70   : > { %1062 = vmatprep.subr.bf16.mxu0 %v1694_v52  ;;  %1135 = vmatprep.subr.bf16.mxu1 %v1696_v55  ;;  %v333_v36 = vld [vmem:[#allocation5 + $0x2e8] sm:$0xff]  ;;  %v1774_v39 = vcombine.high %v328_v33, %v332_v34  ;;  %v320_v41 = vld [vmem:[#allocation5 + $0x280] sm:$0xff]  ;;  %v1773_v45 = vcombine.low %v328_v33, %v332_v34  ;;  %v1732_v33 = vcombine.high %v283_v26, %v287_v27  ;;  %v274_v34 = vld [vmem:[#allocation5 + $0x110] sm:$0xff] }
  0x71   : > { %v1776_v40 = vcombine.high %v329_v35, %v333_v36  ;;  %v324_v42 = vld [vmem:[#allocation5 + $0x2a0] sm:$0xff]  ;;  %v321_v43 = vld [vmem:[#allocation5 + $0x288] sm:$0xff]  ;;  %v1775_v46 = vcombine.low %v329_v35, %v333_v36  ;;  %v278_v35 = vld [vmem:[#allocation5 + $0x130] sm:$0xff] }
  0x72   : > { %v325_v44 = vld [vmem:[#allocation5 + $0x2a8] sm:$0xff]  ;;  %v1766_v47 = vcombine.high %v320_v41, %v324_v42  ;;  %v312_v49 = vld [vmem:[#allocation5 + $0x240] sm:$0xff]  ;;  %v1765_v53 = vcombine.low %v320_v41, %v324_v42  ;;  %v275_v36 = vld [vmem:[#allocation5 + $0x118] sm:$0xff]  ;;  %v1731_v42 = vcombine.low %v283_v26, %v287_v27 }
  0x73   : > { %1063 = vmatpush1.bf16.msra.mxu0 %v1693_v61  ;;  %1136 = vmatpush1.bf16.msra.mxu1 %v1695_v62  ;;  %v1768_v48 = vcombine.high %v321_v43, %v325_v44  ;;  %v316_v50 = vld [vmem:[#allocation5 + $0x260] sm:$0xff]  ;;  %v313_v51 = vld [vmem:[#allocation5 + $0x248] sm:$0xff]  ;;  %v1767_v54 = vcombine.low %v321_v43, %v325_v44  ;;  %v1722_v43 = vcombine.high %v274_v34, %v278_v35  ;;  %v362_v26 = vld [vmem:[#allocation5 + $0x3d0] sm:$0xff] }
  0x74   : > { %1064 = vmatprep.subr.bf16.mxu0 %v1686_v63  ;;  %1137 = vmatprep.subr.bf16.mxu1 %v1688_v0  ;;  %v317_v52 = vld [vmem:[#allocation5 + $0x268] sm:$0xff]  ;;  %v1758_v55 = vcombine.high %v312_v49, %v316_v50  ;;  %v304_v57 = vld [vmem:[#allocation5 + $0x200] sm:$0xff]  ;;  %v1757_v62 = vcombine.low %v312_v49, %v316_v50  ;;  %v271_v49 = vld [vmem:[#allocation5 + $0xf8] sm:$0xff]  ;;  %v1721_v50 = vcombine.low %v274_v34, %v278_v35 }
  0x75   : > { %v1760_v56 = vcombine.high %v313_v51, %v317_v52  ;;  %v308_v59 = vld [vmem:[#allocation5 + $0x220] sm:$0xff]  ;;  %v305_v60 = vld [vmem:[#allocation5 + $0x208] sm:$0xff]  ;;  %v1759_v63 = vcombine.low %v313_v51, %v317_v52  ;;  %v226_v52 = vld [vmem:[%s2268_s6 + $0x50] sm:$0xff] }
  0x76   : > { %v309_v61 = vld [vmem:[#allocation5 + $0x228] sm:$0xff]  ;;  %v1750_v0 = vcombine.high %v304_v57, %v308_v59  ;;  %v224_v51 = vld [vmem:[%s2268_s6 + $0x40] sm:$0xff]  ;;  %v366_v27 = vld [vmem:[#allocation5 + $0x3f0] sm:$0xff] }
  0x77   : > { %1065 = vmatpush1.bf16.msra.mxu0 %v1685_v5  ;;  %1138 = vmatpush1.bf16.msra.mxu1 %v1687_v6  ;;  %v1752_v1 = vcombine.high %v305_v60, %v309_v61  ;;  %v303_v5 = vld [vmem:[#allocation5 + $0x1f8] sm:$0xff]  ;;  %v1749_v6 = vcombine.low %v304_v57, %v308_v59  ;;  %v1751_v9 = vcombine.low %v305_v60, %v309_v61  ;;  %v221_v17 = vld [vmem:[%s2268_s6 + $0x28] sm:$0xff]  ;;  %v262_v57 = vld [vmem:[#allocation5 + $0xb0] sm:$0xff] }
  0x78   : > { %1066 = vmatprep.subr.bf16.mxu0 %v1806_v7  ;;  %1139 = vmatprep.subr.bf16.mxu1 %v1808_v8  ;;  %v216_v7 = vld [vmem:[%s2268_s6] sm:$0xff]  ;;  %v218_v8 = vld [vmem:[%s2268_s6 + $0x10] sm:$0xff]  ;;  %v1748_v11 = vcombine.high %v299_v4, %v303_v5  ;;  %v1747_v20 = vcombine.low %v299_v4, %v303_v5  ;;  %v2290_v25 = vpack.c.bf16 %v223_v18, %v221_v17  ;;  %v259_v59 = vld [vmem:[#allocation5 + $0x98] sm:$0xff] }
  0x79   : > { %v263_v60 = vld [vmem:[#allocation5 + $0xb8] sm:$0xff]  ;;  %v2310_v61 = vpack.c.bf16 %v226_v52, %v224_v51  ;;  %v250_v4 = vld [vmem:[#allocation5 + $0x50] sm:$0xff] }
  0x7a   : > { %v1708_v3 = vcombine.high %v259_v59, %v263_v60  ;;  %v254_v5 = vld [vmem:[#allocation5 + $0x70] sm:$0xff]  ;;  %v243_v18 = vld [vmem:[#allocation5 + $0x18] sm:$0xff] }
  0x7b   : > { %1067 = vmatpush2.bf16.msra.mxu0 %v1805_v13  ;;  %1140 = vmatpush2.bf16.msra.mxu1 %v1807_v14  ;;  %v294_v13 = vld [vmem:[#allocation5 + $0x1b0] sm:$0xff]  ;;  %v291_v14 = vld [vmem:[#allocation5 + $0x198] sm:$0xff] }
  0x7c   : > { %1068 = vmatprep.subr.bf16.mxu0 %v1798_v15  ;;  %1141 = vmatprep.subr.bf16.mxu1 %v1800_v16  ;;  %v2286_v15 = vpack.c.bf16 %v218_v8, %v216_v7  ;;  %v295_v16 = vld [vmem:[#allocation5 + $0x1b8] sm:$0xff]  ;;  %v1737_v28 = vcombine.low %v290_v12, %v294_v13  ;;  %v246_v17 = vld [vmem:[#allocation5 + $0x30] sm:$0xff] }
  0x7d   : > { %v251_v7 = vld [vmem:[#allocation5 + $0x58] sm:$0xff]  ;;  %v354_v34 = vld [vmem:[#allocation5 + $0x390] sm:$0xff] }
  0x7e   : > { %v255_v8 = vld [vmem:[#allocation5 + $0x78] sm:$0xff]  ;;  %v358_v35 = vld [vmem:[#allocation5 + $0x3b0] sm:$0xff] }
  0x7f   : > { %1069 = vmatpush2.bf16.msra.mxu0 %v1797_v21  ;;  %1142 = vmatpush2.bf16.msra.mxu1 %v1799_v22  ;;  %v1738_v21 = vcombine.high %v290_v12, %v294_v13  ;;  %v1740_v22 = vcombine.high %v291_v14, %v295_v16  ;;  %v1707_v12 = vcombine.low %v259_v59, %v263_v60  ;;  %v338_v51 = vld [vmem:[#allocation5 + $0x310] sm:$0xff] }
  0x80   : > { %1070 = vmatprep.subr.bf16.mxu0 %v1790_v23  ;;  %1143 = vmatprep.subr.bf16.mxu1 %v1792_v24  ;;  %v282_v23 = vld [vmem:[#allocation5 + $0x150] sm:$0xff]  ;;  %v1698_v13 = vcombine.high %v250_v4, %v254_v5 }
  0x81   : > { %v286_v24 = vld [vmem:[#allocation5 + $0x170] sm:$0xff] }
  0x82   : > { %v1729_v41 = vcombine.low %v282_v23, %v286_v24  ;;  %v342_v52 = vld [vmem:[#allocation5 + $0x330] sm:$0xff] }
  0x83   : > { %1071 = vmatpush2.bf16.msra.mxu0 %v1789_v29  ;;  %1144 = vmatpush2.bf16.msra.mxu1 %v1791_v30  ;;  %v220_v29 = vld [vmem:[%s2268_s6 + $0x20] sm:$0xff]  ;;  %v222_v30 = vld [vmem:[%s2268_s6 + $0x30] sm:$0xff] }
  0x84   : > { %1072 = vmatprep.subr.bf16.mxu0 %v1782_v31  ;;  %1145 = vmatprep.subr.bf16.mxu1 %v1784_v32  ;;  %v1739_v31 = vcombine.low %v291_v14, %v295_v16  ;;  %v1730_v32 = vcombine.high %v282_v23, %v286_v24  ;;  %v1700_v14 = vcombine.high %v251_v7, %v255_v8  ;;  %v242_v16 = vld [vmem:[#allocation5 + $0x10] sm:$0xff] }
  0x85   : > { %v1690_v23 = vcombine.high %v242_v16, %v246_v17  ;;  %v330_v60 = vld [vmem:[#allocation5 + $0x2d0] sm:$0xff] }
  0x87   : > { %1073 = vmatpush2.bf16.msra.mxu0 %v1781_v37  ;;  %1146 = vmatpush2.bf16.msra.mxu1 %v1783_v38  ;;  %v279_v37 = vld [vmem:[#allocation5 + $0x138] sm:$0xff]  ;;  %v2298_v38 = vpack.c.bf16 %v222_v30, %v220_v29  ;;  %v1689_v30 = vcombine.low %v242_v16, %v246_v17  ;;  %v318_v16 = vld [vmem:[#allocation5 + $0x270] sm:$0xff] }
  0x88   : > { %1074 = vmatprep.subr.bf16.mxu0 %v1774_v39  ;;  %1147 = vmatprep.subr.bf16.mxu1 %v1776_v40  ;;  %v225_v39 = vld [vmem:[%s2268_s6 + $0x48] sm:$0xff]  ;;  %v227_v40 = vld [vmem:[%s2268_s6 + $0x58] sm:$0xff]  ;;  %v1724_v44 = vcombine.high %v275_v36, %v279_v37 }
  0x89   : > { %v367_v29 = vld [vmem:[#allocation5 + $0x3f8] sm:$0xff] }
  0x8a   : > { %v315_v17 = vld [vmem:[#allocation5 + $0x258] sm:$0xff] }
  0x8b   : > { %1075 = vmatpush2.bf16.msra.mxu0 %v1773_v45  ;;  %1148 = vmatpush2.bf16.msra.mxu1 %v1775_v46  ;;  %v266_v45 = vld [vmem:[#allocation5 + $0xd0] sm:$0xff] }
  0x8c   : > { %1076 = vmatprep.subr.bf16.mxu0 %v1766_v47  ;;  %1149 = vmatprep.subr.bf16.mxu1 %v1768_v48  ;;  %v270_v46 = vld [vmem:[#allocation5 + $0xf0] sm:$0xff]  ;;  %v2302_v47 = vpack.c.bf16 %v227_v40, %v225_v39  ;;  %v267_v48 = vld [vmem:[#allocation5 + $0xd8] sm:$0xff]  ;;  %v1809_v39 = vcombine.low %v362_v26, %v366_v27 }
  0x8f   : > { %1077 = vmatpush2.bf16.msra.mxu0 %v1765_v53  ;;  %1150 = vmatpush2.bf16.msra.mxu1 %v1767_v54  ;;  %v1723_v53 = vcombine.low %v275_v36, %v279_v37  ;;  %v1714_v54 = vcombine.high %v266_v45, %v270_v46  ;;  %v355_v36 = vld [vmem:[#allocation5 + $0x398] sm:$0xff] }
  0x90   : > { %1078 = vmatprep.subr.bf16.mxu0 %v1758_v55  ;;  %1151 = vmatprep.subr.bf16.mxu1 %v1760_v56  ;;  %v1716_v55 = vcombine.high %v267_v48, %v271_v49  ;;  %v258_v56 = vld [vmem:[#allocation5 + $0x90] sm:$0xff]  ;;  %v359_v37 = vld [vmem:[#allocation5 + $0x3b8] sm:$0xff] }
  0x91   : > { %v1706_v2 = vcombine.high %v258_v56, %v262_v57 }
  0x93   : > { %1079 = vmatpush2.bf16.msra.mxu0 %v1757_v62  ;;  %1152 = vmatpush2.bf16.msra.mxu1 %v1759_v63  ;;  %v229_v62 = vld [vmem:[%s2268_s6 + $0x68] sm:$0xff]  ;;  %v231_v63 = vld [vmem:[%s2268_s6 + $0x78] sm:$0xff] }
  0x94   : > { %1080 = vmatprep.subr.bf16.mxu0 %v1750_v0  ;;  %1153 = vmatprep.subr.bf16.mxu1 %v1752_v1  ;;  %v1713_v0 = vcombine.low %v266_v45, %v270_v46  ;;  %v1715_v1 = vcombine.low %v267_v48, %v271_v49  ;;  %v347_v45 = vld [vmem:[#allocation5 + $0x358] sm:$0xff]  ;;  %v1801_v48 = vcombine.low %v354_v34, %v358_v35 }
  0x95   : > { %v351_v46 = vld [vmem:[#allocation5 + $0x378] sm:$0xff]  ;;  %v1803_v49 = vcombine.low %v355_v36, %v359_v37 }
  0x97   : > { %1081 = vmatpush2.bf16.msra.mxu0 %v1749_v6  ;;  %1154 = vmatpush2.bf16.msra.mxu1 %v1751_v9  ;;  %v2314_v6 = vpack.c.bf16 %v231_v63, %v229_v62  ;;  %v1705_v9 = vcombine.low %v258_v56, %v262_v57  ;;  %v1795_v56 = vcombine.low %v347_v45, %v351_v46  ;;  %v334_v62 = vld [vmem:[#allocation5 + $0x2f0] sm:$0xff]  ;;  %v331_v63 = vld [vmem:[#allocation5 + $0x2d8] sm:$0xff] }
  0x98   : > { %1196 = vmatprep.subr.bf16.mxu0 %v1746_v10  ;;  %1269 = vmatprep.subr.bf16.mxu1 %v1748_v11  ;;  %v228_v10 = vld [vmem:[%s2268_s6 + $0x60] sm:$0xff]  ;;  %v230_v11 = vld [vmem:[%s2268_s6 + $0x70] sm:$0xff]  ;;  %v1786_v57 = vcombine.high %v338_v51, %v342_v52 }
  0x9a   : > { %1083 = vmatmul.mubr.bf16.vlgmr.msra.gmra.mxu0 %v2286_v15  ;;  %1156 = vmatmul.mubr.bf16.vlgmr.msra.gmra.mxu1 %v2286_v15 }
  0x9b   : > { %1197 = vmatpush1.bf16.msra.mxu0 %v1745_v19  ;;  %1270 = vmatpush1.bf16.msra.mxu1 %v1747_v20  ;;  %v247_v19 = vld [vmem:[#allocation5 + $0x38] sm:$0xff]  ;;  %v2322_v20 = vpack.c.bf16 %v230_v11, %v228_v10  ;;  %v1777_v10 = vcombine.low %v330_v60, %v334_v62 }
  0x9c   : > { %1198 = vmatprep.subr.bf16.mxu0 %v1738_v21  ;;  %1271 = vmatprep.subr.bf16.mxu1 %v1740_v22  ;;  %v1697_v21 = vcombine.low %v250_v4, %v254_v5  ;;  %v1699_v22 = vcombine.low %v251_v7, %v255_v8  ;;  %v1692_v24 = vcombine.high %v243_v18, %v247_v19  ;;  %v322_v5 = vld [vmem:[#allocation5 + $0x290] sm:$0xff]  ;;  %v323_v8 = vld [vmem:[#allocation5 + $0x298] sm:$0xff] }
  0x9d   : > { %1092 = vmatprep.mubr.bf16.mxu0 %v2290_v25  ;;  %1165 = vmatprep.mubr.bf16.mxu1 %v2290_v25  ;;  %v326_v7 = vld [vmem:[#allocation5 + $0x2b0] sm:$0xff] }
  0x9f   : > { %1199 = vmatpush1.bf16.msra.mxu0 %v1737_v28  ;;  %1272 = vmatpush1.bf16.msra.mxu1 %v1739_v31  ;;  %v363_v28 = vld [vmem:[#allocation5 + $0x3d8] sm:$0xff]  ;;  %v1691_v31 = vcombine.low %v243_v18, %v247_v19  ;;  %v1769_v19 = vcombine.low %v322_v5, %v326_v7 }
  0xa0   : > { %1200 = vmatprep.subr.bf16.mxu0 %v1730_v32  ;;  %1273 = vmatprep.subr.bf16.mxu1 %v1732_v33  ;;  %v1810_v32 = vcombine.high %v362_v26, %v366_v27  ;;  %v1812_v33 = vcombine.high %v363_v28, %v367_v29  ;;  %v1811_v40 = vcombine.low %v363_v28, %v367_v29  ;;  %v319_v18 = vld [vmem:[#allocation5 + $0x278] sm:$0xff]  ;;  %v310_v26 = vld [vmem:[#allocation5 + $0x230] sm:$0xff] }
  0xa1   : > { %v307_v27 = vld [vmem:[#allocation5 + $0x218] sm:$0xff] }
  0xa2   : > { %1093 = vmatmul.mubr.bf16.gmra.mxu0 %v2298_v38  ;;  %1166 = vmatmul.mubr.bf16.gmra.mxu1 %v2298_v38  ;;  %v311_v28 = vld [vmem:[#allocation5 + $0x238] sm:$0xff] }
  0xa3   : > { %1201 = vmatpush1.bf16.msra.mxu0 %v1729_v41  ;;  %1274 = vmatpush1.bf16.msra.mxu1 %v1731_v42  ;;  %v1802_v41 = vcombine.high %v354_v34, %v358_v35  ;;  %v1804_v42 = vcombine.high %v355_v36, %v359_v37  ;;  %v1755_v34 = vcombine.low %v307_v27, %v311_v28  ;;  %v2345_v35 = vld [vmem:[#allocation7] sm:$0xff] }
  0xa4   : > { %1202 = vmatprep.subr.bf16.mxu0 %v1722_v43  ;;  %1275 = vmatprep.subr.bf16.mxu1 %v1724_v44  ;;  %v346_v43 = vld [vmem:[#allocation5 + $0x350] sm:$0xff] }
  0xa5   : > { %1102 = vmatprep.mubr.bf16.mxu0 %v2302_v47  ;;  %1175 = vmatprep.mubr.bf16.mxu1 %v2302_v47  ;;  %v350_v44 = vld [vmem:[#allocation5 + $0x370] sm:$0xff] }
  0xa7   : > { %1203 = vmatpush1.bf16.msra.mxu0 %v1721_v50  ;;  %1276 = vmatpush1.bf16.msra.mxu1 %v1723_v53  ;;  %v1794_v50 = vcombine.high %v346_v43, %v350_v44  ;;  %v339_v53 = vld [vmem:[#allocation5 + $0x318] sm:$0xff] }
  0xa8   : > { %1204 = vmatprep.subr.bf16.mxu0 %v1714_v54  ;;  %1277 = vmatprep.subr.bf16.mxu1 %v1716_v55  ;;  %v343_v54 = vld [vmem:[#allocation5 + $0x338] sm:$0xff]  ;;  %v1793_v55 = vcombine.low %v346_v43, %v350_v44 }
  0xa9   : > { %v1788_v59 = vcombine.high %v339_v53, %v343_v54 }
  0xaa   : > { %1103 = vmatmul.mubr.bf16.gmra.mxu0 %v2310_v61  ;;  %1176 = vmatmul.mubr.bf16.gmra.mxu1 %v2310_v61 }
  0xab   : > { %1205 = vmatpush1.bf16.msra.mxu0 %v1713_v0  ;;  %1278 = vmatpush1.bf16.msra.mxu1 %v1715_v1  ;;  %v335_v0 = vld [vmem:[#allocation5 + $0x2f8] sm:$0xff]  ;;  %v1785_v1 = vcombine.low %v338_v51, %v342_v52 }
  0xac   : > { %1206 = vmatprep.subr.bf16.mxu0 %v1706_v2  ;;  %1279 = vmatprep.subr.bf16.mxu1 %v1708_v3  ;;  %v1787_v2 = vcombine.low %v339_v53, %v343_v54  ;;  %v1778_v3 = vcombine.high %v330_v60, %v334_v62  ;;  %v1780_v4 = vcombine.high %v331_v63, %v335_v0 }
  0xad   : > { %1112 = vmatprep.mubr.bf16.mxu0 %v2314_v6  ;;  %1185 = vmatprep.mubr.bf16.mxu1 %v2314_v6  ;;  %v1779_v11 = vcombine.low %v331_v63, %v335_v0 }
  0xaf   : > { %1207 = vmatpush1.bf16.msra.mxu0 %v1705_v9  ;;  %1280 = vmatpush1.bf16.msra.mxu1 %v1707_v12  ;;  %v327_v9 = vld [vmem:[#allocation5 + $0x2b8] sm:$0xff]  ;;  %v1770_v12 = vcombine.high %v322_v5, %v326_v7 }
  0xb0   : > { %1208 = vmatprep.subr.bf16.mxu0 %v1698_v13  ;;  %1281 = vmatprep.subr.bf16.mxu1 %v1700_v14  ;;  %v1772_v13 = vcombine.high %v323_v8, %v327_v9  ;;  %v314_v14 = vld [vmem:[#allocation5 + $0x250] sm:$0xff] }
  0xb1   : > { %v1761_v29 = vcombine.low %v314_v14, %v318_v16 }
  0xb2   : > { %1113 = vmatmul.mubr.bf16.gmra.mxu0 %v2322_v20  ;;  %1186 = vmatmul.mubr.bf16.gmra.mxu1 %v2322_v20 }
  0xb3   : > { %1209 = vmatpush1.bf16.msra.mxu0 %v1697_v21  ;;  %1282 = vmatpush1.bf16.msra.mxu1 %v1699_v22  ;;  %v1771_v21 = vcombine.low %v323_v8, %v327_v9  ;;  %v1762_v22 = vcombine.high %v314_v14, %v318_v16 }
  0xb4   : > { %1210 = vmatprep.subr.bf16.mxu0 %v1690_v23  ;;  %1283 = vmatprep.subr.bf16.mxu1 %v1692_v24  ;;  %v1764_v23 = vcombine.high %v315_v17, %v319_v18  ;;  %v306_v24 = vld [vmem:[#allocation5 + $0x210] sm:$0xff] }
  0xb5   : > { %1228 = vmatprep.mubr.bf16.mxu0 %v2280_v58  ;;  %1301 = vmatprep.mubr.bf16.mxu1 %v2280_v58  ;;  %v1796_v58 = vcombine.high %v347_v45, %v351_v46 }
  0xb7   : > { %1211 = vmatpush1.bf16.msra.mxu0 %v1689_v30  ;;  %1284 = vmatpush1.bf16.msra.mxu1 %v1691_v31  ;;  %v1763_v30 = vcombine.low %v315_v17, %v319_v18  ;;  %v1754_v31 = vcombine.high %v306_v24, %v310_v26 }
  0xb8   : > { %1212 = vmatprep.subr.bf16.mxu0 %v1810_v32  ;;  %1285 = vmatprep.subr.bf16.mxu1 %v1812_v33  ;;  %v1756_v32 = vcombine.high %v307_v27, %v311_v28  ;;  %v1753_v33 = vcombine.low %v306_v24, %v310_v26 }
  0xbb   : > { %1213 = vmatpush2.bf16.msra.mxu0 %v1809_v39  ;;  %1286 = vmatpush2.bf16.msra.mxu1 %v1811_v40 }
  0xbc   : > { %1214 = vmatprep.subr.bf16.mxu0 %v1802_v41  ;;  %1287 = vmatprep.subr.bf16.mxu1 %v1804_v42 }
  0xbf   : > { %1215 = vmatpush2.bf16.msra.mxu0 %v1801_v48  ;;  %1288 = vmatpush2.bf16.msra.mxu1 %v1803_v49 }
  0xc0   : > { %1216 = vmatprep.subr.bf16.mxu0 %v1794_v50  ;;  %1289 = vmatprep.subr.bf16.mxu1 %v1796_v58 }
  0xc3   : > { %1217 = vmatpush2.bf16.msra.mxu0 %v1793_v55  ;;  %1290 = vmatpush2.bf16.msra.mxu1 %v1795_v56 }
  0xc4   : > { %1218 = vmatprep.subr.bf16.mxu0 %v1786_v57  ;;  %1291 = vmatprep.subr.bf16.mxu1 %v1788_v59 }
  0xc7   : > { %1219 = vmatpush2.bf16.msra.mxu0 %v1785_v1  ;;  %1292 = vmatpush2.bf16.msra.mxu1 %v1787_v2 }
  0xc8   : > { %1220 = vmatprep.subr.bf16.mxu0 %v1778_v3  ;;  %1293 = vmatprep.subr.bf16.mxu1 %v1780_v4 }
  0xcb   : > { %1221 = vmatpush2.bf16.msra.mxu0 %v1777_v10  ;;  %1294 = vmatpush2.bf16.msra.mxu1 %v1779_v11 }
  0xcc   : > { %1222 = vmatprep.subr.bf16.mxu0 %v1770_v12  ;;  %1295 = vmatprep.subr.bf16.mxu1 %v1772_v13 }
  0xcf   : > { %1223 = vmatpush2.bf16.msra.mxu0 %v1769_v19  ;;  %1296 = vmatpush2.bf16.msra.mxu1 %v1771_v21 }
  0xd0   : > { %1224 = vmatprep.subr.bf16.mxu0 %v1762_v22  ;;  %1297 = vmatprep.subr.bf16.mxu1 %v1764_v23 }
  0xd3   : > { %1225 = vmatpush2.bf16.msra.mxu0 %v1761_v29  ;;  %1298 = vmatpush2.bf16.msra.mxu1 %v1763_v30 }
  0xd4   : > { %1226 = vmatprep.subr.bf16.mxu0 %v1754_v31  ;;  %1299 = vmatprep.subr.bf16.mxu1 %v1756_v32 }
  0xd7   : > { %1227 = vmatpush2.bf16.msra.mxu0 %v1753_v33  ;;  %1300 = vmatpush2.bf16.msra.mxu1 %v1755_v34 }
  0xda   : > { %1229 = vmatmul.mubr.bf16.vlgmr.msra.gmra.mxu0 %v2286_v15  ;;  %1302 = vmatmul.mubr.bf16.vlgmr.msra.gmra.mxu1 %v2286_v15  ;;  %v370_v15 = vlaneseq }
  0xdb   : > { %1238 = vmatprep.mubr.bf16.mxu0 %v2290_v25  ;;  %1311 = vmatprep.mubr.bf16.mxu1 %v2290_v25 }
  0xdc   : > { %v2342_v25 = vshrl.u32 %v370_v15, 7 }
  0xde   : > { %v384_v36 = vsub.s32 3, %v2342_v25 }
  0xe0   : > { %v2360_v40 = vrot.slane %v2345_v35, %v384_v36 }
  0xe2   : > { %1239 = vmatmul.mubr.bf16.gmra.mxu0 %v2298_v38  ;;  %1312 = vmatmul.mubr.bf16.gmra.mxu1 %v2298_v38  ;;  %v372_v38 = vsub.s32 0, %v2342_v25 }
  0xe3   : > { %1248 = vmatprep.mubr.bf16.mxu0 %v2302_v47  ;;  %1321 = vmatprep.mubr.bf16.mxu1 %v2302_v47  ;;  %v380_v47 = vsub.s32 2, %v2342_v25 }
  0xe5   : > { %v2354_v37 = vrot.slane %v2345_v35, %v380_v47 }
  0xea   : > { %1249 = vmatmul.mubr.bf16.gmra.mxu0 %v2310_v61  ;;  %1322 = vmatmul.mubr.bf16.gmra.mxu1 %v2310_v61  ;;  %v376_v61 = vsub.s32 1, %v2342_v25 }
  0xeb   : > { %1258 = vmatprep.mubr.bf16.mxu0 %v2314_v6  ;;  %1331 = vmatprep.mubr.bf16.mxu1 %v2314_v6  ;;  %v2351_v6 = vrot.slane %v2345_v35, %v372_v38 }
  0xf2   : > { %1259 = vmatmul.mubr.bf16.gmra.mxu0 %v2322_v20  ;;  %1332 = vmatmul.mubr.bf16.gmra.mxu1 %v2322_v20  ;;  %v2357_v20 = vrot.slane %v2345_v35, %v376_v61 }
 0x15a   : > { %v1084_v39 = vpop.f32.mrf.mxu0  ;;  %v1157_v42 = vpop.f32.mrf.mxu1 }
 0x15b   : > { %v1085_v41 = vadd.f32 %v1084_v39, %v2351_v6  ;;  %v1158_v43 = vadd.f32 %v1157_v42, %v2354_v37 }
 0x15c   : > { %v1086_v44 = vpop.f32.mrf.mxu0  ;;  %v1159_v46 = vpop.f32.mrf.mxu1 }
 0x15d   : > { %v1087_v45 = vadd.f32 %v1086_v44, %v2357_v20  ;;  %v1160_v48 = vadd.f32 %v1159_v46, %v2360_v40 }
 0x15e   : > { %v1088_v49 = vpop.f32.mrf.mxu0  ;;  %v1161_v58 = vpop.f32.mrf.mxu1 }
 0x15f   : > { %v1851_v50 = vpack.c.bf16 %v1087_v45, %v1085_v41  ;;  %v1852_v51 = vpack.c.bf16 %v1160_v48, %v1158_v43  ;;  %v1089_v53 = vadd.f32 %v1088_v49, %v2351_v6  ;;  %v1162_v56 = vadd.f32 %v1161_v58, %v2354_v37 }
 0x160   : > { %v1090_v52 = vpop.f32.mrf.mxu0  ;;  %v1163_v55 = vpop.f32.mrf.mxu1 }
 0x161   : > { %1534 = vst [vmem:[%s2367_s20] sm:$0xff] %v1851_v50  ;;  %v1091_v54 = vadd.f32 %v1090_v52, %v2357_v20  ;;  %1535 = vst [vmem:[%s2367_s20 + $0x8] sm:$0xff] %v1852_v51  ;;  %v1164_v57 = vadd.f32 %v1163_v55, %v2360_v40 }
 0x162   : > { %v1094_v59 = vpop.f32.mrf.mxu0  ;;  %v1167_v63 = vpop.f32.mrf.mxu1 }
 0x163   : > { %v1855_v60 = vpack.c.bf16 %v1091_v54, %v1089_v53  ;;  %v1095_v62 = vadd.f32 %v1094_v59, %v2351_v6  ;;  %v1856_v0 = vpack.c.bf16 %v1164_v57, %v1162_v56  ;;  %v1168_v1 = vadd.f32 %v1167_v63, %v2354_v37 }
 0x164   : > { %v1096_v2 = vpop.f32.mrf.mxu0  ;;  %v1169_v4 = vpop.f32.mrf.mxu1 }
 0x165   : > { %1538 = vst [vmem:[%s2367_s20 + $0x20] sm:$0xff] %v1855_v60  ;;  %v1097_v3 = vadd.f32 %v1096_v2, %v2357_v20  ;;  %1539 = vst [vmem:[%s2367_s20 + $0x28] sm:$0xff] %v1856_v0  ;;  %v1170_v5 = vadd.f32 %v1169_v4, %v2360_v40  ;;  %v388_v0 = vsub.s32 4, %v2342_v25 }
 0x166   : > { %v1098_v7 = vpop.f32.mrf.mxu0  ;;  %v1171_v10 = vpop.f32.mrf.mxu1 }
 0x167   : > { %v1859_v8 = vpack.c.bf16 %v1097_v3, %v1095_v62  ;;  %v1099_v9 = vadd.f32 %v1098_v7, %v2351_v6  ;;  %v1860_v11 = vpack.c.bf16 %v1170_v5, %v1168_v1  ;;  %v1172_v12 = vadd.f32 %v1171_v10, %v2354_v37 }
 0x168   : > { %v1100_v13 = vpop.f32.mrf.mxu0  ;;  %v1173_v16 = vpop.f32.mrf.mxu1  ;;  %v396_v1 = vsub.s32 6, %v2342_v25  ;;  %v2418_v2 = vrot.slane %v2345_v35, %v388_v0 }
 0x169   : > { %1542 = vst [vmem:[%s2367_s20 + $0x40] sm:$0xff] %v1859_v8  ;;  %v1101_v14 = vadd.f32 %v1100_v13, %v2357_v20  ;;  %1543 = vst [vmem:[%s2367_s20 + $0x48] sm:$0xff] %v1860_v11  ;;  %v1174_v17 = vadd.f32 %v1173_v16, %v2360_v40 }
 0x16a   : > { %v1104_v18 = vpop.f32.mrf.mxu0  ;;  %v1177_v22 = vpop.f32.mrf.mxu1  ;;  %v2424_v3 = vrot.slane %v2345_v35, %v396_v1 }
 0x16b   : > { %v1863_v19 = vpack.c.bf16 %v1101_v14, %v1099_v9  ;;  %v1105_v21 = vadd.f32 %v1104_v18, %v2351_v6  ;;  %v1864_v23 = vpack.c.bf16 %v1174_v17, %v1172_v12  ;;  %v1178_v24 = vadd.f32 %v1177_v22, %v2354_v37 }
 0x16c   : > { %v1106_v26 = vpop.f32.mrf.mxu0  ;;  %v1179_v28 = vpop.f32.mrf.mxu1 }
 0x16d   : > { %1546 = vst [vmem:[%s2367_s20 + $0x60] sm:$0xff] %v1863_v19  ;;  %v1107_v27 = vadd.f32 %v1106_v26, %v2357_v20  ;;  %1547 = vst [vmem:[%s2367_s20 + $0x68] sm:$0xff] %v1864_v23  ;;  %v1180_v29 = vadd.f32 %v1179_v28, %v2360_v40 }
 0x16e   : > { %v1108_v30 = vpop.f32.mrf.mxu0  ;;  %v1181_v33 = vpop.f32.mrf.mxu1 }
 0x16f   : > { %v1867_v31 = vpack.c.bf16 %v1107_v27, %v1105_v21  ;;  %v1109_v32 = vadd.f32 %v1108_v30, %v2351_v6  ;;  %v1868_v34 = vpack.c.bf16 %v1180_v29, %v1178_v24  ;;  %v1182_v15 = vadd.f32 %v1181_v33, %v2354_v37 }
 0x170   : > { %v1110_v38 = vpop.f32.mrf.mxu0  ;;  %v1183_v61 = vpop.f32.mrf.mxu1 }
 0x171   : > { %1550 = vst [vmem:[%s2367_s20 + $0x80] sm:$0xff] %v1867_v31  ;;  %v1111_v47 = vadd.f32 %v1110_v38, %v2357_v20  ;;  %1551 = vst [vmem:[%s2367_s20 + $0x88] sm:$0xff] %v1868_v34  ;;  %v1184_v36 = vadd.f32 %v1183_v61, %v2360_v40 }
 0x172   : > { %v1114_v39 = vpop.f32.mrf.mxu0  ;;  %v1187_v43 = vpop.f32.mrf.mxu1 }
 0x173   : > { %v1871_v41 = vpack.c.bf16 %v1111_v47, %v1109_v32  ;;  %v1115_v42 = vadd.f32 %v1114_v39, %v2351_v6  ;;  %v1872_v44 = vpack.c.bf16 %v1184_v36, %v1182_v15  ;;  %v1188_v45 = vadd.f32 %v1187_v43, %v2354_v37 }
 0x174   : > { %v1116_v46 = vpop.f32.mrf.mxu0  ;;  %v1189_v49 = vpop.f32.mrf.mxu1 }
 0x175   : > { %1554 = vst [vmem:[%s2367_s20 + $0xa0] sm:$0xff] %v1871_v41  ;;  %v1117_v48 = vadd.f32 %v1116_v46, %v2357_v20  ;;  %1555 = vst [vmem:[%s2367_s20 + $0xa8] sm:$0xff] %v1872_v44  ;;  %v1190_v50 = vadd.f32 %v1189_v49, %v2360_v40 }
 0x176   : > { %v1118_v58 = vpop.f32.mrf.mxu0  ;;  %v1191_v53 = vpop.f32.mrf.mxu1 }
 0x177   : > { %v1875_v51 = vpack.c.bf16 %v1117_v48, %v1115_v42  ;;  %v1119_v52 = vadd.f32 %v1118_v58, %v2351_v6  ;;  %v1876_v54 = vpack.c.bf16 %v1190_v50, %v1188_v45  ;;  %v1192_v55 = vadd.f32 %v1191_v53, %v2354_v37 }
 0x178   : > { %v1120_v56 = vpop.f32.mrf.mxu0  ;;  %v1193_v59 = vpop.f32.mrf.mxu1  ;;  %v392_v6 = vsub.s32 5, %v2342_v25  ;;  %v400_v37 = vsub.s32 7, %v2342_v25 }
 0x179   : > { %1558 = vst [vmem:[%s2367_s20 + $0xc0] sm:$0xff] %v1875_v51  ;;  %v1121_v57 = vadd.f32 %v1120_v56, %v2357_v20  ;;  %1559 = vst [vmem:[%s2367_s20 + $0xc8] sm:$0xff] %v1876_v54  ;;  %v1194_v60 = vadd.f32 %v1193_v59, %v2360_v40 }
 0x17a   : > { %v2421_v20 = vrot.slane %v2345_v35, %v392_v6  ;;  %v2427_v4 = vrot.slane %v2345_v35, %v400_v37 }
 0x17b   : > { %v1879_v62 = vpack.c.bf16 %v1121_v57, %v1119_v52  ;;  %v1880_v63 = vpack.c.bf16 %v1194_v60, %v1192_v55 }
 0x17d   : > { %1562 = vst [vmem:[%s2367_s20 + $0xe0] sm:$0xff] %v1879_v62  ;;  %1563 = vst [vmem:[%s2367_s20 + $0xe8] sm:$0xff] %v1880_v63 }
 0x19a   : > { %v1230_v40 = vpop.f32.mrf.mxu0  ;;  %v1303_v5 = vpop.f32.mrf.mxu1 }
 0x19b   : > { %v1231_v8 = vadd.f32 %v1230_v40, %v2418_v2  ;;  %v1304_v10 = vadd.f32 %v1303_v5, %v2424_v3 }
 0x19c   : > { %v1232_v7 = vpop.f32.mrf.mxu0  ;;  %v1305_v9 = vpop.f32.mrf.mxu1 }
 0x19d   : > { %v1233_v25 = vadd.f32 %v1232_v7, %v2421_v20  ;;  %v1306_v11 = vadd.f32 %v1305_v9, %v2427_v4 }
 0x19e   : > { %v1234_v12 = vpop.f32.mrf.mxu0  ;;  %v1307_v14 = vpop.f32.mrf.mxu1 }
 0x19f   : > { %v1853_v13 = vpack.c.bf16 %v1233_v25, %v1231_v8  ;;  %v1854_v16 = vpack.c.bf16 %v1306_v11, %v1304_v10  ;;  %v1235_v35 = vadd.f32 %v1234_v12, %v2418_v2  ;;  %v1308_v21 = vadd.f32 %v1307_v14, %v2424_v3 }
 0x1a0   : > { %v1236_v17 = vpop.f32.mrf.mxu0  ;;  %v1309_v19 = vpop.f32.mrf.mxu1 }
 0x1a1   : > { %1536 = vst [vmem:[%s2367_s20 + $0x10] sm:$0xff] %v1853_v13  ;;  %v1237_v18 = vadd.f32 %v1236_v17, %v2421_v20  ;;  %1537 = vst [vmem:[%s2367_s20 + $0x18] sm:$0xff] %v1854_v16  ;;  %v1310_v22 = vadd.f32 %v1309_v19, %v2427_v4 }
 0x1a2   : > { %v1240_v23 = vpop.f32.mrf.mxu0  ;;  %v1313_v26 = vpop.f32.mrf.mxu1 }
 0x1a3   : > { %v1857_v24 = vpack.c.bf16 %v1237_v18, %v1235_v35  ;;  %v1858_v27 = vpack.c.bf16 %v1310_v22, %v1308_v21  ;;  %v1241_v29 = vadd.f32 %v1240_v23, %v2418_v2  ;;  %v1314_v32 = vadd.f32 %v1313_v26, %v2424_v3 }
 0x1a4   : > { %v1242_v28 = vpop.f32.mrf.mxu0  ;;  %v1315_v31 = vpop.f32.mrf.mxu1 }
 0x1a5   : > { %1540 = vst [vmem:[%s2367_s20 + $0x30] sm:$0xff] %v1857_v24  ;;  %v1243_v30 = vadd.f32 %v1242_v28, %v2421_v20  ;;  %1541 = vst [vmem:[%s2367_s20 + $0x38] sm:$0xff] %v1858_v27  ;;  %v1316_v33 = vadd.f32 %v1315_v31, %v2427_v4 }
 0x1a6   : > { %v1244_v34 = vpop.f32.mrf.mxu0  ;;  %v1317_v38 = vpop.f32.mrf.mxu1 }
 0x1a7   : > { %v1861_v15 = vpack.c.bf16 %v1243_v30, %v1241_v29  ;;  %v1862_v47 = vpack.c.bf16 %v1316_v33, %v1314_v32  ;;  %v1245_v36 = vadd.f32 %v1244_v34, %v2418_v2  ;;  %v1318_v42 = vadd.f32 %v1317_v38, %v2424_v3 }
 0x1a8   : > { %v1246_v61 = vpop.f32.mrf.mxu0  ;;  %v1319_v41 = vpop.f32.mrf.mxu1 }
 0x1a9   : > { %1544 = vst [vmem:[%s2367_s20 + $0x50] sm:$0xff] %v1861_v15  ;;  %v1247_v39 = vadd.f32 %v1246_v61, %v2421_v20  ;;  %1545 = vst [vmem:[%s2367_s20 + $0x58] sm:$0xff] %v1862_v47  ;;  %v1320_v43 = vadd.f32 %v1319_v41, %v2427_v4 }
 0x1aa   : > { %v1250_v44 = vpop.f32.mrf.mxu0  ;;  %v1323_v46 = vpop.f32.mrf.mxu1 }
 0x1ab   : > { %v1865_v45 = vpack.c.bf16 %v1247_v39, %v1245_v36  ;;  %v1866_v48 = vpack.c.bf16 %v1320_v43, %v1318_v42  ;;  %v1251_v50 = vadd.f32 %v1250_v44, %v2418_v2  ;;  %v1324_v52 = vadd.f32 %v1323_v46, %v2424_v3 }
 0x1ac   : > { %v1252_v49 = vpop.f32.mrf.mxu0  ;;  %v1325_v51 = vpop.f32.mrf.mxu1 }
 0x1ad   : > { %1548 = vst [vmem:[%s2367_s20 + $0x70] sm:$0xff] %v1865_v45  ;;  %v1253_v58 = vadd.f32 %v1252_v49, %v2421_v20  ;;  %1549 = vst [vmem:[%s2367_s20 + $0x78] sm:$0xff] %v1866_v48  ;;  %v1326_v53 = vadd.f32 %v1325_v51, %v2427_v4 }
 0x1ae   : > { %v1254_v54 = vpop.f32.mrf.mxu0  ;;  %v1327_v56 = vpop.f32.mrf.mxu1 }
 0x1af   : > { %v1869_v55 = vpack.c.bf16 %v1253_v58, %v1251_v50  ;;  %v1870_v57 = vpack.c.bf16 %v1326_v53, %v1324_v52  ;;  %v1255_v60 = vadd.f32 %v1254_v54, %v2418_v2  ;;  %v1328_v0 = vadd.f32 %v1327_v56, %v2424_v3 }
 0x1b0   : > { %v1256_v59 = vpop.f32.mrf.mxu0  ;;  %v1329_v63 = vpop.f32.mrf.mxu1 }
 0x1b1   : > { %1552 = vst [vmem:[%s2367_s20 + $0x90] sm:$0xff] %v1869_v55  ;;  %v1257_v62 = vadd.f32 %v1256_v59, %v2421_v20  ;;  %1553 = vst [vmem:[%s2367_s20 + $0x98] sm:$0xff] %v1870_v57  ;;  %v1330_v6 = vadd.f32 %v1329_v63, %v2427_v4 }
 0x1b2   : > { %v1260_v1 = vpop.f32.mrf.mxu0  ;;  %v1333_v40 = vpop.f32.mrf.mxu1 }
 0x1b3   : > { %v1873_v37 = vpack.c.bf16 %v1257_v62, %v1255_v60  ;;  %v1874_v5 = vpack.c.bf16 %v1330_v6, %v1328_v0  ;;  %v1261_v8 = vadd.f32 %v1260_v1, %v2418_v2  ;;  %v1334_v10 = vadd.f32 %v1333_v40, %v2424_v3 }
 0x1b4   : > { %v1262_v7 = vpop.f32.mrf.mxu0  ;;  %v1335_v9 = vpop.f32.mrf.mxu1 }
 0x1b5   : > { %1556 = vst [vmem:[%s2367_s20 + $0xb0] sm:$0xff] %v1873_v37  ;;  %v1263_v25 = vadd.f32 %v1262_v7, %v2421_v20  ;;  %1557 = vst [vmem:[%s2367_s20 + $0xb8] sm:$0xff] %v1874_v5  ;;  %v1336_v11 = vadd.f32 %v1335_v9, %v2427_v4 }
 0x1b6   : > { %v1264_v12 = vpop.f32.mrf.mxu0  ;;  %v1337_v14 = vpop.f32.mrf.mxu1 }
 0x1b7   : > { %v1877_v13 = vpack.c.bf16 %v1263_v25, %v1261_v8  ;;  %v1878_v16 = vpack.c.bf16 %v1336_v11, %v1334_v10  ;;  %v1265_v35 = vadd.f32 %v1264_v12, %v2418_v2  ;;  %v1338_v21 = vadd.f32 %v1337_v14, %v2424_v3 }
 0x1b8   : > { %v1266_v17 = vpop.f32.mrf.mxu0  ;;  %v1339_v19 = vpop.f32.mrf.mxu1 }
 0x1b9   : > { %1560 = vst [vmem:[%s2367_s20 + $0xd0] sm:$0xff] %v1877_v13  ;;  %v1267_v18 = vadd.f32 %v1266_v17, %v2421_v20  ;;  %1561 = vst [vmem:[%s2367_s20 + $0xd8] sm:$0xff] %v1878_v16  ;;  %v1340_v22 = vadd.f32 %v1339_v19, %v2427_v4 }
 0x1bb   : > { %v1881_v23 = vpack.c.bf16 %v1267_v18, %v1265_v35  ;;  %v1882_v2 = vpack.c.bf16 %v1340_v22, %v1338_v21 }
 0x1bd   : > { %1564 = vst [vmem:[%s2367_s20 + $0xf0] sm:$0xff] %v1881_v23  ;;  %1565 = vst [vmem:[%s2367_s20 + $0xf8] sm:$0xff] %v1882_v2 }
 0x1be   : > { %2050 = shalt.err (!%p2047_p9)
}
 0x1bf   : > { %s2051_s23 = scalar_lea.hbm %s2480_s8, 4096  ;;  %s2055_s4 = scalar_lea.hbm %s2530_s3, 8192 }
 0x1c0   : > { %p2052_p13 = scmp.ne.s32.totalorder %s2480_s8, %s2051_s23  ;;  %p2056_p4 = scmp.lt.s32.totalorder %s2480_s8, %s2530_s3 }
 0x1c1   : > { %p2057_p8 = scmp.lt.s32.totalorder %s2055_s4, %s2051_s23 }
 0x1c2   : > { %p2053_p5 = pnand %p2052_p13, %p2546_p10 }
 0x1c3   : > { %p2058_p3 = por %p2057_p8, %p2056_p4 }
 0x1c4   : > { %p2054_p0 = pneg %p2053_p5 }
 0x1c6   : > { %p2059_p11 = pnand %p2058_p3, %p2054_p0 }
 0x1c8   : > { %2062 = shalt.err (!%p2059_p11)
}
 0x1c9   : > { %s2115_s18 = smov 512   ;;  %s2116_s20 = smov 32  }
 0x1ca   : > { %1894 = dma.vmem_to_hbm [thread:$0]  (%p2546_p10), %s2482_s27, 4096, %s2480_s8, %s1567_s16, %s2115_s18, %s2115_s18, %s2116_s20  }
 0x1cb PF: > { %s1595_s25 = sand.u32 1, %s2093_s12   ;;  %p2547_p1 = scmp.ne.s32.totalorder %s2536_s19, 0 }
 0x1cc   : > { %p2548_p2 = scmp.ge.s32.totalorder %s2105_s15, 2  ;;  %s1596_s28 = scalar_lea.sflag [#allocation4], %s1595_s25 }
 0x1ce   : > { %p1908_p6 = pnand %p2548_p2, %p2547_p1 }
 0x1d0   : > { %p1909_p12 = pneg %p1908_p6 }
 0x1d2   : > { %2088 = dma.done.wait (%p1909_p12), %s1596_s28, 4096  }
 0x1d3   : > { %2090 = vsyncadd (%p1909_p12), %s1596_s28, 4294963200  ;;  %p17_p7 = scmp.ge.s32.totalorder %s2209_s7, 4   ;;  %s2549_s12 = smov %s2097_s13 }
 0x1d4   : > { %s2550_s13 = smov %s2101_s14  ;;  %s2551_s14 = smov %s2225_s11 }
 0x1d5   : > { %s2552_s15 = smov %s2209_s7  ;;  %19 = sbr.rel (!%p17_p7) target bundleno = 6 (0x6), region = 85 }
 0x1da   :  { %1601 = vsyncpa [#allocation3], 1 }
 0x1db   :  { %1603 = vsyncpa [#allocation3 + $0x1], 1 }
 0x1dc   :  { %1604 = vsyncpa [#allocation6], 1 }
 0x1dd   :  { %1605 = vsyncpa [#allocation4], 1 }
 0x1de   :  { %1607 = vsyncpa [#allocation4 + $0x1], 1 }

</bundles_post_ra>
